<compile_context>
chip_gen: v6e
topology: v6e:2x2x1
jax: 0.10.0
libtpu: 0.0.40
codegen_flags: <defaults>
</compile_context>

<pallas_src>
import functools

import jax
import jax.numpy as jnp
from jax.experimental import pallas as pl
from jax.experimental.pallas import tpu as pltpu


def _ln4d_kernel(x_ref, g_ref, b_ref, o_ref, *, eps, inv_c):
    # x_ref block: (B_blk, C, block_n) f32 ; g_ref / b_ref: (C, 1)
    x = x_ref[...]
    mu = jnp.sum(x, axis=1, keepdims=True) * inv_c          # (B_blk, 1, block_n)
    d = x - mu
    var = jnp.sum(d * d, axis=1, keepdims=True) * inv_c     # two-pass, unbiased=False
    denom = jnp.sqrt(var + eps) + eps                       # PyTorch double-eps quirk
    inv = pl.reciprocal(denom, approx=True)                 # EUP vrcp
    inv = inv * (2.0 - denom * inv)                         # one Newton step -> f32 acc
    o_ref[...] = d * inv * g_ref[...] + b_ref[...]


def _pick_tiling(B, C, N, itemsize=4, target_bytes=2 << 20):
    """Choose (B_blk, block_n) so each grid step moves ~target_bytes of x."""
    # Number of (b, n) columns per step (one column = C values).
    max_cols = max(128, target_bytes // (C * itemsize))

    # Lane-axis tile: full N when it fits the budget (always a legal block
    # dim), otherwise a multiple of 128 with a masked ragged edge.
    if N <= max_cols:
        block_n = N
    else:
        block_n = max(128, (max_cols // 128) * 128)

    # Fold batch rows into the tile when a single N-slab is still small.
    b_blk = min(B, max(1, max_cols // block_n))

    # Guarantee >= 2 grid steps (both v7x TensorCores get work) when possible.
    steps = (-(-B // b_blk)) * (-(-N // block_n))
    if steps < 2:
        if B >= 2:
            b_blk = -(-B // 2)
        elif N >= 256:
            block_n = max(128, ((-(-N // 2) + 127) // 128) * 128)
    return b_blk, block_n


def layer_norm_4d(x, gamma, beta, eps=1e-5):
    """x: (B, C, T, F) float32; gamma/beta broadcastable to (1, C, 1, 1)."""
    B, C, T, F = x.shape
    N = T * F
    x2 = x.reshape(B, C, N).astype(jnp.float32)             # contiguous collapse: free
    g = gamma.reshape(C, 1).astype(jnp.float32)
    b = beta.reshape(C, 1).astype(jnp.float32)

    b_blk, block_n = _pick_tiling(B, C, N)
    grid = (pl.cdiv(B, b_blk), pl.cdiv(N, block_n))

    cost = pl.CostEstimate(
        flops=8 * B * C * N,
        transcendentals=B * N,
        bytes_accessed=2 * B * C * N * 4 + 2 * C * 4,
    )

    out = pl.pallas_call(
        functools.partial(_ln4d_kernel, eps=float(eps), inv_c=1.0 / C),
        out_shape=jax.ShapeDtypeStruct((B, C, N), jnp.float32),
        grid_spec=pltpu.PrefetchScalarGridSpec(
            num_scalar_prefetch=0,
            grid=grid,
            in_specs=[
                pl.BlockSpec((b_blk, C, block_n), lambda bi, ni: (bi, 0, ni)),
                pl.BlockSpec((C, 1), lambda bi, ni: (0, 0)),
                pl.BlockSpec((C, 1), lambda bi, ni: (0, 0)),
            ],
            out_specs=pl.BlockSpec((b_blk, C, block_n), lambda bi, ni: (bi, 0, ni)),
        ),
        compiler_params=pltpu.CompilerParams(
            dimension_semantics=("parallel", "parallel")),
        cost_estimate=cost,
    )(x2, g, b)
    return out.reshape(B, C, T, F)


def _reference(x, gamma, beta, eps):
    mu = jnp.mean(x, axis=1, keepdims=True)
    var = jnp.mean((x - mu) ** 2, axis=1, keepdims=True)
    std = jnp.sqrt(var + eps)
    return (x - mu) / (std + eps) * gamma + beta


if __name__ == "__main__":
    eps = 1e-5
    key = jax.random.PRNGKey(0)
    kx, kg, kb, kx2 = jax.random.split(key, 4)

    # Primary test: module-consistent small shape (B, C, T, F) = (2, 4, 16, 16).
    B, C, T, F = 2, 4, 16, 16
    x = jax.random.normal(kx, (B, C, T, F), jnp.float32)
    gamma = 1.0 + 0.1 * jax.random.normal(kg, (1, C, 1, 1), jnp.float32)
    beta = 0.1 * jax.random.normal(kb, (1, C, 1, 1), jnp.float32)

    fwd = jax.jit(layer_norm_4d)
    out = fwd(x, gamma, beta)
    jax.block_until_ready(out)

    ref = _reference(x, gamma, beta, eps)
    assert out.shape == (B, C, T, F), out.shape
    assert bool(jnp.all(jnp.isfinite(out)))
    err = float(jnp.max(jnp.abs(out - ref)))
    assert jnp.allclose(out, ref, rtol=1e-5, atol=1e-5), err

    # Secondary test: non-128-divisible N with a non-centered input to
    # exercise the ragged/masked tiling path and the two-pass variance.
    B2, C2, T2, F2 = 1, 4, 10, 50            # N = 500 -> ragged 128-wide tiles
    x2 = 3.0 + jax.random.normal(kx2, (B2, C2, T2, F2), jnp.float32)
    out2 = jax.jit(layer_norm_4d)(x2, jnp.ones((1, C2, 1, 1), jnp.float32),
                                  jnp.zeros((1, C2, 1, 1), jnp.float32))
    jax.block_until_ready(out2)
    ref2 = _reference(x2, jnp.ones((1, C2, 1, 1), jnp.float32),
                      jnp.zeros((1, C2, 1, 1), jnp.float32), eps)
    assert bool(jnp.all(jnp.isfinite(out2)))
    err2 = float(jnp.max(jnp.abs(out2 - ref2)))
    assert jnp.allclose(out2, ref2, rtol=1e-5, atol=1e-5), err2

    print("KERNEL_OK")
</pallas_src>

<mosaic_0001>
module attributes {stable_mosaic.version = 11 : i64} {
  func.func @_ln4d_kernel(%arg0: i32, %arg1: i32, %arg2: memref<1x4x256xf32, #tpu.memory_space<vmem>>, %arg3: memref<4x1xf32, #tpu.memory_space<vmem>>, %arg4: memref<4x1xf32, #tpu.memory_space<vmem>>, %arg5: memref<1x4x256xf32, #tpu.memory_space<vmem>>) attributes {dimension_semantics = [#tpu.dimension_semantics<parallel>, #tpu.dimension_semantics<parallel>], iteration_bounds = array<i64: 2, 1>, scalar_prefetch = 0 : i64, scratch_operands = 0 : i64, tpu.core_type = #tpu.core_type<tc>, window_params = [{transform_indices = @transform_0, window_bounds = array<i64: 1, 4, 256>}, {pipeline_mode = #tpu.pipeline_mode<synchronous>, transform_indices = @transform_1, window_bounds = array<i64: 4, 1>}, {pipeline_mode = #tpu.pipeline_mode<synchronous>, transform_indices = @transform_2, window_bounds = array<i64: 4, 1>}, {transform_indices = @transform_3, window_bounds = array<i64: 1, 4, 256>}]} {
    %c0 = arith.constant 0 : index
    %c0_0 = arith.constant 0 : index
    %c0_1 = arith.constant 0 : index
    %0 = vector.load %arg2[%c0, %c0_0, %c0_1] : memref<1x4x256xf32, #tpu.memory_space<vmem>>, vector<1x4x256xf32>
    %cst = arith.constant dense<0.000000e+00> : vector<1x256xf32>
    %1 = vector.multi_reduction <add>, %0, %cst [1] : vector<1x4x256xf32> to vector<1x256xf32>
    %2 = vector.shape_cast %1 : vector<1x256xf32> to vector<1x1x256xf32>
    %cst_2 = arith.constant 2.500000e-01 : f32
    %3 = vector.broadcast %cst_2 : f32 to vector<1x1x256xf32>
    %4 = arith.mulf %2, %3 : vector<1x1x256xf32>
    %5 = vector.broadcast %4 : vector<1x1x256xf32> to vector<1x4x256xf32>
    %6 = arith.subf %0, %5 : vector<1x4x256xf32>
    %7 = arith.mulf %6, %6 : vector<1x4x256xf32>
    %cst_3 = arith.constant dense<0.000000e+00> : vector<1x256xf32>
    %8 = vector.multi_reduction <add>, %7, %cst_3 [1] : vector<1x4x256xf32> to vector<1x256xf32>
    %9 = vector.shape_cast %8 : vector<1x256xf32> to vector<1x1x256xf32>
    %cst_4 = arith.constant 2.500000e-01 : f32
    %10 = vector.broadcast %cst_4 : f32 to vector<1x1x256xf32>
    %11 = arith.mulf %9, %10 : vector<1x1x256xf32>
    %cst_5 = arith.constant 9.99999974E-6 : f32
    %12 = vector.broadcast %cst_5 : f32 to vector<1x1x256xf32>
    %13 = arith.addf %11, %12 : vector<1x1x256xf32>
    %14 = math.sqrt %13 : vector<1x1x256xf32>
    %cst_6 = arith.constant 9.99999974E-6 : f32
    %15 = vector.broadcast %cst_6 : f32 to vector<1x1x256xf32>
    %16 = arith.addf %14, %15 : vector<1x1x256xf32>
    %17 = tpu.reciprocal %16 {approx = true} : vector<1x1x256xf32> -> vector<1x1x256xf32>
    %18 = arith.mulf %16, %17 : vector<1x1x256xf32>
    %cst_7 = arith.constant 2.000000e+00 : f32
    %19 = vector.broadcast %cst_7 : f32 to vector<1x1x256xf32>
    %20 = arith.subf %19, %18 : vector<1x1x256xf32>
    %21 = arith.mulf %17, %20 : vector<1x1x256xf32>
    %22 = vector.broadcast %21 : vector<1x1x256xf32> to vector<1x4x256xf32>
    %23 = arith.mulf %6, %22 : vector<1x4x256xf32>
    %c0_8 = arith.constant 0 : index
    %c0_9 = arith.constant 0 : index
    %24 = vector.load %arg3[%c0_8, %c0_9] : memref<4x1xf32, #tpu.memory_space<vmem>>, vector<4x1xf32>
    %25 = vector.shape_cast %24 : vector<4x1xf32> to vector<1x4x1xf32>
    %26 = vector.broadcast %25 : vector<1x4x1xf32> to vector<1x4x256xf32>
    %27 = arith.mulf %23, %26 : vector<1x4x256xf32>
    %c0_10 = arith.constant 0 : index
    %c0_11 = arith.constant 0 : index
    %28 = vector.load %arg4[%c0_10, %c0_11] : memref<4x1xf32, #tpu.memory_space<vmem>>, vector<4x1xf32>
    %29 = vector.shape_cast %28 : vector<4x1xf32> to vector<1x4x1xf32>
    %30 = vector.broadcast %29 : vector<1x4x1xf32> to vector<1x4x256xf32>
    %31 = arith.addf %27, %30 : vector<1x4x256xf32>
    %c0_12 = arith.constant 0 : index
    %c0_13 = arith.constant 0 : index
    %c0_14 = arith.constant 0 : index
    %32 = vector.load %arg5[%c0_12, %c0_13, %c0_14] : memref<1x4x256xf32, #tpu.memory_space<vmem>>, vector<1x4x256xf32>
    tpu.vector_store %arg5[%c0_12, %c0_13, %c0_14], %31 {strides = array<i32>} : memref<1x4x256xf32, #tpu.memory_space<vmem>>, vector<1x4x256xf32>,
    return
  }
  func.func @transform_0(%arg0: i32, %arg1: i32) -> (i32, i32, i32) {
    %c0_i32 = arith.constant 0 : i32
    %c0_i32_0 = arith.constant 0 : i32
    return %arg0, %c0_i32, %arg1 : i32, i32, i32
  }
  func.func @transform_1(%arg0: i32, %arg1: i32) -> (i32, i32) {
    %c0_i32 = arith.constant 0 : i32
    %c0_i32_0 = arith.constant 0 : i32
    %c0_i32_1 = arith.constant 0 : i32
    return %c0_i32, %c0_i32_0 : i32, i32
  }
  func.func @transform_2(%arg0: i32, %arg1: i32) -> (i32, i32) {
    %c0_i32 = arith.constant 0 : i32
    %c0_i32_0 = arith.constant 0 : i32
    %c0_i32_1 = arith.constant 0 : i32
    return %c0_i32, %c0_i32_0 : i32, i32
  }
  func.func @transform_3(%arg0: i32, %arg1: i32) -> (i32, i32, i32) {
    %c0_i32 = arith.constant 0 : i32
    %c0_i32_0 = arith.constant 0 : i32
    return %arg0, %c0_i32, %arg1 : i32, i32, i32
  }
}

</mosaic_0001>

<bundles_post_ra>
// kernel: layer_norm_4d.1
= control target key start
LH: loop header
LB: loop body
LE: loop exit
PB: predicated region body
PF: predicated region fallthrough
CT: control target
= control target key end

     0   :  { %s498_s12 = smov 0   ;;  %s500_s13 = smov 0   ;;  %s548_s0 = inlined_call_operand.vmem [shape: f32[2,4,256], index: 0, kind: input, shape index: {}]   ;;  %s549_s1 = inlined_call_operand.vmem [shape: f32[4,1], index: 1, kind: input, shape index: {}]   ;;  %s550_s2 = inlined_call_operand.vmem [shape: f32[4,1], index: 2, kind: input, shape index: {}]   ;;  %s551_s3 = inlined_call_operand.vmem [shape: f32[2,4,256], index: 3, kind: output, shape index: {}]  }
   0x1   :  { %s502_s14 = smov 0  }
   0x2 LB: > { %s25_s15 = sadd.s32 1, %s470_s13  ;;  %p407_p0 = scmp.ge.s32.totalorder %s474_s14, 1  ;;  %s474_s14 = sphi %s502_s14, %s13_s14   ;;  %s470_s13 = sphi %s500_s13, %s553_s13   ;;  %s466_s12 = sphi %s498_s12, %s552_s12  }
   0x3   : > { %p27_p1 = scmp.ge.s32.totalorder %s25_s15, 2  ;;  %p158_p2 = scmp.lt.s32.totalorder %s474_s14, 3 }
   0x5   : > { %s555_s15 = smov (%p27_p1, %s25_s15), 0  ;;  %p159_p3 = pnand %p407_p0, %p158_p2 }
   0x6   : > { %p191_p4 = scmp.lt.s32.totalorder (!%p159_p3), %s466_s12, 1 }
   0x7   : > { %162 = sbr.rel (%p159_p3) target bundleno = 147 (0x93), region = 32 }
   0xc   : > { %v287_v0 = vld [vmem:[%s549_s1] sm:$0xf]  ;;  %v476_v1 = vmov 0   ;;  %s557_s12 = smov (!%p191_p4, %s466_s12), 1  ;;  %vm214_vm0 = vcmask 1043456   ;;  %v295_v61 = vlaneseq }
   0xd   : > { %442 = vset.pattern.permute.xlu0 %v476_v1  ;;  %v301_v2 = vld [vmem:[%s550_s2] sm:$0xf]  ;;  %s414_s20 = sshll.u32 %s557_s12, 3  ;;  %v477_v59 = vmov 839922192  }
   0xe   : > { %290 = vperm.xlu0 %442, %v287_v0   ;;  %s198_s23 = scalar_lea.vmem %s548_s0, %s414_s20  ;;  %v293_v60 = vunpack.c.l.s4 %v477_v59  ;;  %v296_v1 = vshrl.u32 %v295_v61, 7  ;;  %s208_s26 = scalar_lea.vmem %s551_s3, %s414_s20 }
   0xf   : > { %v210_v3 = vld [vmem:[%s198_s23] sm:$0xff] }
  0x10   : > { %v212_v4 = vcombine.high %v210_v3, %v210_v3  ;;  %v215_v5 = vsel %vm214_vm0, %v210_v3, 0.0  ;;  %v294_v0 = vunpack.c.0.s8 %v293_v60 }
  0x11   : > { %v216_v6 = vrot.slane %v215_v5, 4 }
  0x12   : > { %304 = vperm.xlu0 %442, %v301_v2   ;;  %v222_v7 = vsel %vm214_vm0, %v212_v4, 0.0  ;;  %v297_v4 = vsub.s32 %v294_v0, %v296_v1 }
  0x13   : > { %v217_v8 = vadd.f32 %v216_v6, %v215_v5  ;;  %v223_v9 = vrot.slane %v222_v7, 4 }
  0x15   : > { %v218_v10 = vrot.slane %v217_v8, 2  ;;  %v224_v11 = vadd.f32 %v223_v9, %v222_v7 }
  0x17   : > { %v219_v12 = vadd.f32 %v218_v10, %v217_v8  ;;  %v225_v13 = vrot.slane %v224_v11, 2 }
  0x19   : > { %v220_v14 = vrot.slane %v219_v12, 1  ;;  %v226_v15 = vadd.f32 %v225_v13, %v224_v11 }
  0x1b   : > { %v221_v16 = vadd.f32 %v220_v14, %v219_v12  ;;  %v227_v17 = vrot.slane %v226_v15, 1 }
  0x1d   : > { %v228_v18 = vadd.f32 %v227_v17, %v226_v15  ;;  %v229_v19 = vmul.f32 0.25, %v221_v16 }
  0x1f   : > { %v230_v20 = vmul.f32 0.25, %v228_v18 }
  0x21   : > { %v233_v21 = vcombine.low %v229_v19, %v230_v20 }
  0x23   : > { %v235_v22 = vsub.f32 %v210_v3, %v233_v21 }
  0x25   : > { %v236_v23 = vmul.f32 %v235_v22, %v235_v22 }
  0x27   : > { %v238_v24 = vcombine.high %v236_v23, %v236_v23  ;;  %v240_v25 = vsel %vm214_vm0, %v236_v23, 0.0 }
  0x28   : > { %v241_v26 = vrot.slane %v240_v25, 4 }
  0x29   : > { %v247_v27 = vsel %vm214_vm0, %v238_v24, 0.0 }
  0x2a   : > { %v248_v28 = vrot.slane %v247_v27, 4  ;;  %v242_v29 = vadd.f32 %v241_v26, %v240_v25 }
  0x2c   : > { %v249_v30 = vadd.f32 %v248_v28, %v247_v27  ;;  %v243_v31 = vrot.slane %v242_v29, 2 }
  0x2e   : > { %v250_v32 = vrot.slane %v249_v30, 2  ;;  %v244_v33 = vadd.f32 %v243_v31, %v242_v29 }
  0x30   : > { %v251_v34 = vadd.f32 %v250_v32, %v249_v30  ;;  %v245_v35 = vrot.slane %v244_v33, 1 }
  0x32   : > { %v252_v36 = vrot.slane %v251_v34, 1  ;;  %v246_v37 = vadd.f32 %v245_v35, %v244_v33 }
  0x34   : > { %v253_v38 = vadd.f32 %v252_v36, %v251_v34  ;;  %v254_v39 = vmul.f32 0.25, %v246_v37 }
  0x36   : > { %v255_v40 = vmul.f32 0.25, %v253_v38  ;;  %v256_v41 = vadd.f32 1e-05, %v254_v39 }
  0x38   : > { %v257_v42 = vadd.f32 1e-05, %v255_v40  ;;  %444 = vrsqrt.f32 %v256_v41  ;;  %vm260_vm1 = vcmp.eq.f32.partialorder %v256_v41, inf  ;;  %v263_v47 = vand.u32 2147483648, %v256_v41 }
  0x39   : > { %vm262_vm3 = vcmp.eq.f32.partialorder %v256_v41, 0.0 }
  0x3a   : > { %446 = vrsqrt.f32 %v257_v42  ;;  %vm267_vm2 = vcmp.eq.f32.partialorder %v257_v42, inf  ;;  %v270_v49 = vand.u32 2147483648, %v257_v42  ;;  %vm269_vm4 = vcmp.eq.f32.partialorder %v257_v42, 0.0 }
  0x45   : > { %v445_v43 = vpop.eup %444 }
  0x46   : > { %v259_v45 = vmul.f32 %v445_v43, %v256_v41 }
  0x47   : > { %v447_v44 = vpop.eup %446 }
  0x48   : > { %v266_v46 = vmul.f32 %v447_v44, %v257_v42  ;;  %v261_v48 = vsel %vm260_vm1, %v256_v41, %v259_v45 }
  0x49   : > { %v264_v51 = vsel %vm262_vm3, %v263_v47, %v261_v48 }
  0x4a   : > { %v268_v50 = vsel %vm267_vm2, %v257_v42, %v266_v46  ;;  %v272_v53 = vadd.f32 1e-05, %v264_v51 }
  0x4b   : > { %v271_v52 = vsel %vm269_vm4, %v270_v49, %v268_v50 }
  0x4c   : > { %v273_v54 = vadd.f32 1e-05, %v271_v52  ;;  %448 = vrcp.f32 %v272_v53 }
  0x4e   : > { %450 = vrcp.f32 %v273_v54 }
  0x59   : > { %v449_v55 = vpop.eup %448 }
  0x5a   : > { %v276_v57 = vmul.f32 %v449_v55, %v272_v53 }
  0x5b   : > { %v451_v56 = vpop.eup %450 }
  0x5c   : > { %v277_v58 = vmul.f32 %v451_v56, %v273_v54  ;;  %v278_v62 = vsub.f32 2.0, %v276_v57 }
  0x5e   : > { %v279_v63 = vsub.f32 2.0, %v277_v58  ;;  %v280_v2 = vmul.f32 %v449_v55, %v278_v62 }
  0x60   : > { %v281_v3 = vmul.f32 %v451_v56, %v279_v63 }
  0x62   : > { %v284_v5 = vcombine.low %v280_v2, %v281_v3 }
  0x64   : > { %v286_v7 = vmul.f32 %v284_v5, %v235_v22 }
  0x89   : > { %v291_v6 = vpop.permute.xlu0 %290 }
  0x8a   : > { %v298_v8 = vrot.slane %v291_v6, %v297_v4 }
  0x8c   : > { %v300_v10 = vmul.f32 %v298_v8, %v286_v7 }
  0x8d   : > { %v305_v9 = vpop.permute.xlu0 %304 }
  0x8e   : > { %v312_v11 = vrot.slane %v305_v9, %v297_v4 }
  0x90   : > { %v314_v12 = vadd.f32 %v312_v11, %v300_v10 }
  0x92   : > { %315 = vst [vmem:[%s208_s26] sm:$0xff] %v314_v12 }
  0x93 PF: > { %s13_s14 = sadd.s32 1, %s474_s14   ;;  %s552_s12 = smov %s470_s13 }
  0x94   : > { %p10_p5 = scmp.ge.s32.totalorder %s13_s14, 4   ;;  %s553_s13 = smov %s555_s15 }
  0x96   :  { %12 = sbr.rel (!%p10_p5) target bundleno = 2 (0x2), region = 62 }

</bundles_post_ra>
